<compile_context>
chip_gen: v7x
topology: tpu7x:2x2x1
jax: 0.10.0
libtpu: 0.0.40
codegen_flags: <defaults>
</compile_context>

<pallas_src>
import functools

import jax
import jax.numpy as jnp
from jax.experimental import pallas as pl
from jax.experimental.pallas import tpu as pltpu

H1_PAD = 128     # fc1 width 64 padded to full lane width
H2_PAD = 128     # fc2 width 32 padded to full lane width
LANE = 128
NEG_BIG = -1e30  # padded output logits -> softmax weight exactly 0 (f32 only!)
TB_MAX = 2048    # batch-tile cap; keeps double-buffered tiles a few MiB


def _round_up(x, m):
    return ((x + m - 1) // m) * m


def composer_mlp_kernel(x_ref, w1_ref, b1_ref, w2_ref, b2_ref, w3_ref, b3_ref, o_ref):
    x = x_ref[...]  # (TB, in) bf16

    # fc1 + ReLU  (padded lanes: w/b are zero -> ReLU(0) = 0, inert downstream)
    h1 = jnp.dot(x, w1_ref[...], preferred_element_type=jnp.float32) + b1_ref[...]
    h1 = jnp.maximum(h1, 0.0).astype(jnp.bfloat16)

    # fc2 + ReLU
    h2 = jnp.dot(h1, w2_ref[...], preferred_element_type=jnp.float32) + b2_ref[...]
    h2 = jnp.maximum(h2, 0.0).astype(jnp.bfloat16)

    # fc3 (padded output lanes get bias = -1e30 in f32 -> exp underflows to 0)
    logits = jnp.dot(h2, w3_ref[...], preferred_element_type=jnp.float32) + b3_ref[...]

    # numerically stable softmax over the feature (lane) axis
    m = jnp.max(logits, axis=1, keepdims=True)
    e = jnp.exp(logits - m)
    s = jnp.sum(e, axis=1, keepdims=True)
    inv = pl.reciprocal(s, approx=True)       # EUP slot (otherwise idle)
    inv = inv * (2.0 - s * inv)               # one Newton step -> near-f32 accuracy
    o_ref[...] = (e * inv).astype(o_ref.dtype)


def _pad_params(params, input_size, output_size):
    """Pad (in,out)-layout params to lane-dense kernel shapes; weights -> bf16."""
    out_pad = _round_up(max(output_size, LANE), LANE)

    w1 = (jnp.zeros((input_size, H1_PAD), jnp.float32)
          .at[:, :64].set(params["w1"]).astype(jnp.bfloat16))
    b1 = jnp.zeros((1, H1_PAD), jnp.float32).at[:, :64].set(params["b1"])

    w2 = (jnp.zeros((H1_PAD, H2_PAD), jnp.float32)
          .at[:64, :32].set(params["w2"]).astype(jnp.bfloat16))
    b2 = jnp.zeros((1, H2_PAD), jnp.float32).at[:, :32].set(params["b2"])

    w3 = (jnp.zeros((H2_PAD, out_pad), jnp.float32)
          .at[:32, :output_size].set(params["w3"]).astype(jnp.bfloat16))
    b3 = jnp.full((1, out_pad), NEG_BIG, jnp.float32).at[:, :output_size].set(params["b3"])

    return (w1, b1, w2, b2, w3, b3), out_pad


def _choose_batch_tile(B):
    """Pick (TB, B_pad): balanced tiles, >=2 grid steps when the batch allows (v7x megacore)."""
    B8 = _round_up(B, 8)
    if B8 < 32:                       # too small to split usefully -> single full-array tile
        return B8, B8
    n_tiles = max(-(-B8 // TB_MAX), 2)            # ceil-div, at least 2 steps
    TB = _round_up(-(-B8 // n_tiles), 16)         # 16-row align (bf16 sublane packing)
    return TB, TB * n_tiles


@functools.partial(jax.jit, static_argnames=("input_size", "output_size"))
def composer_nn_forward(x, params, *, input_size, output_size):
    """x: (B, input_size) float (ideally already bf16 upstream). params: (in,out)-layout."""
    B = x.shape[0]
    (w1, b1, w2, b2, w3, b3), out_pad = _pad_params(params, input_size, output_size)

    # bf16 MXU operands (single MXU pass, half the input HBM/VMEM bytes).
    x = x.astype(jnp.bfloat16)

    TB, B_pad = _choose_batch_tile(B)
    if B_pad != B:
        x = jnp.pad(x, ((0, B_pad - B), (0, 0)))
    grid = (B_pad // TB,)

    weight_specs = [
        pl.BlockSpec(w1.shape, lambda i: (0, 0)),
        pl.BlockSpec(b1.shape, lambda i: (0, 0)),
        pl.BlockSpec(w2.shape, lambda i: (0, 0)),
        pl.BlockSpec(b2.shape, lambda i: (0, 0)),
        pl.BlockSpec(w3.shape, lambda i: (0, 0)),
        pl.BlockSpec(b3.shape, lambda i: (0, 0)),
    ]

    # Scoped-VMEM limit sized from the actual double-buffered footprint
    # (v5e default is only 16 MiB; v7x physical VMEM is 64 MiB -> cap at 56 MiB).
    x_tile_bytes = TB * input_size * 2
    out_tile_bytes = TB * out_pad * 4
    weight_bytes = (w1.size + w2.size + w3.size) * 2 + (b1.size + b2.size + b3.size) * 4
    vmem_need = 2 * (x_tile_bytes + out_tile_bytes + weight_bytes)
    vmem_limit = int(min(56 << 20, max(32 << 20, vmem_need + (8 << 20))))

    cost = pl.CostEstimate(
        flops=2 * B_pad * (input_size * H1_PAD + H1_PAD * H2_PAD + H2_PAD * out_pad),
        transcendentals=B_pad * out_pad,
        bytes_accessed=2 * B_pad * input_size + 4 * B_pad * out_pad + weight_bytes,
    )

    out_padded = pl.pallas_call(
        composer_mlp_kernel,
        out_shape=jax.ShapeDtypeStruct((B_pad, out_pad), jnp.float32),
        grid=grid,
        in_specs=[pl.BlockSpec((TB, input_size), lambda i: (i, 0))] + weight_specs,
        out_specs=pl.BlockSpec((TB, out_pad), lambda i: (i, 0)),
        compiler_params=pltpu.CompilerParams(
            dimension_semantics=("parallel",),   # shards batch tiles across v7x's 2 TCs
            vmem_limit_bytes=vmem_limit,
        ),
        cost_estimate=cost,
    )(x, w1, b1, w2, b2, w3, b3)

    return out_padded[:B, :output_size]


def init_params(key, input_size, output_size):
    """Deterministic synthetic parameters (PyTorch Linear init, pre-transposed to (in, out))."""
    ks = jax.random.split(key, 6)

    def uniform(k, shape, fan_in):
        bound = 1.0 / jnp.sqrt(fan_in)
        return jax.random.uniform(k, shape, jnp.float32, -bound, bound)

    w1 = uniform(ks[0], (input_size, 64), input_size)
    b1 = uniform(ks[1], (1, 64), input_size)
    w2 = uniform(ks[2], (64, 32), 64)
    b2 = uniform(ks[3], (1, 32), 64)
    w3 = uniform(ks[4], (32, output_size), 32)
    b3 = uniform(ks[5], (1, output_size), 32)
    return {"w1": w1, "b1": b1, "w2": w2, "b2": b2, "w3": w3, "b3": b3}


def reference_forward(x, p):
    h1 = jnp.maximum(x @ p["w1"] + p["b1"], 0.0)
    h2 = jnp.maximum(h1 @ p["w2"] + p["b2"], 0.0)
    logits = h2 @ p["w3"] + p["b3"]
    return jax.nn.softmax(logits, axis=1)


if __name__ == "__main__":
    key = jax.random.PRNGKey(0)
    k_x, k_p = jax.random.split(key)

    batch = 8
    input_size = 32
    output_size = 16

    x = jax.random.normal(k_x, (batch, input_size), jnp.float32)
    params = init_params(k_p, input_size, output_size)

    out = composer_nn_forward(x, params, input_size=input_size, output_size=output_size)
    out = jax.block_until_ready(out)

    ref = reference_forward(x, params)
    assert out.shape == (batch, output_size)
    # bf16 MXU operands -> relaxed elementwise tolerance vs the pure-f32 reference.
    assert jnp.allclose(out, ref, atol=5e-3, rtol=1e-2), float(jnp.max(jnp.abs(out - ref)))
    # Newton-refined reciprocal -> rows normalize to 1 to near-f32 accuracy.
    assert jnp.allclose(jnp.sum(out, axis=1), 1.0, atol=1e-3)

    print("KERNEL_OK")
</pallas_src>

<mosaic_0001>
module attributes {stable_mosaic.version = 11 : i64} {
  func.func @composer_mlp_kernel(%arg0: i32, %arg1: memref<8x32xbf16, #tpu.memory_space<vmem>>, %arg2: memref<32x128xbf16, #tpu.memory_space<vmem>>, %arg3: memref<1x128xf32, #tpu.memory_space<vmem>>, %arg4: memref<128x128xbf16, #tpu.memory_space<vmem>>, %arg5: memref<1x128xf32, #tpu.memory_space<vmem>>, %arg6: memref<128x128xbf16, #tpu.memory_space<vmem>>, %arg7: memref<1x128xf32, #tpu.memory_space<vmem>>, %arg8: memref<8x128xf32, #tpu.memory_space<vmem>>) attributes {dimension_semantics = [#tpu.dimension_semantics<parallel>], iteration_bounds = array<i64: 1>, scalar_prefetch = 0 : i64, scratch_operands = 0 : i64, tpu.core_type = #tpu.core_type<tc>, window_params = [{transform_indices = @transform_0, window_bounds = array<i64: 8, 32>}, {pipeline_mode = #tpu.pipeline_mode<synchronous>, transform_indices = @transform_1, window_bounds = array<i64: 32, 128>}, {pipeline_mode = #tpu.pipeline_mode<synchronous>, transform_indices = @transform_2, window_bounds = array<i64: 1, 128>}, {pipeline_mode = #tpu.pipeline_mode<synchronous>, transform_indices = @transform_3, window_bounds = array<i64: 128, 128>}, {pipeline_mode = #tpu.pipeline_mode<synchronous>, transform_indices = @transform_4, window_bounds = array<i64: 1, 128>}, {pipeline_mode = #tpu.pipeline_mode<synchronous>, transform_indices = @transform_5, window_bounds = array<i64: 128, 128>}, {pipeline_mode = #tpu.pipeline_mode<synchronous>, transform_indices = @transform_6, window_bounds = array<i64: 1, 128>}, {transform_indices = @transform_7, window_bounds = array<i64: 8, 128>}]} {
    %c0 = arith.constant 0 : index
    %c0_0 = arith.constant 0 : index
    %0 = vector.load %arg1[%c0, %c0_0] : memref<8x32xbf16, #tpu.memory_space<vmem>>, vector<8x32xbf16>
    %c0_1 = arith.constant 0 : index
    %c0_2 = arith.constant 0 : index
    %1 = vector.load %arg2[%c0_1, %c0_2] : memref<32x128xbf16, #tpu.memory_space<vmem>>, vector<32x128xbf16>
    %cst = arith.constant dense<0.000000e+00> : vector<8x128xf32>
    %2 = tpu.matmul %0, %1, %cst {dimension_numbers = #tpu.dot_dimension_numbers<[1], [0], [0], [1], [0, 0, 1, 1], [], []>} : vector<8x32xbf16>, vector<32x128xbf16>, vector<8x128xf32> -> vector<8x128xf32>
    %c0_3 = arith.constant 0 : index
    %c0_4 = arith.constant 0 : index
    %3 = vector.load %arg3[%c0_3, %c0_4] : memref<1x128xf32, #tpu.memory_space<vmem>>, vector<1x128xf32>
    %4 = vector.broadcast %3 : vector<1x128xf32> to vector<8x128xf32>
    %5 = arith.addf %2, %4 : vector<8x128xf32>
    %cst_5 = arith.constant 0.000000e+00 : f32
    %6 = vector.broadcast %cst_5 : f32 to vector<8x128xf32>
    %7 = arith.maximumf %5, %6 : vector<8x128xf32>
    %8 = arith.truncf %7 : vector<8x128xf32> to vector<8x128xbf16>
    %c0_6 = arith.constant 0 : index
    %c0_7 = arith.constant 0 : index
    %9 = vector.load %arg4[%c0_6, %c0_7] : memref<128x128xbf16, #tpu.memory_space<vmem>>, vector<128x128xbf16>
    %cst_8 = arith.constant dense<0.000000e+00> : vector<8x128xf32>
    %10 = tpu.matmul %8, %9, %cst_8 {dimension_numbers = #tpu.dot_dimension_numbers<[1], [0], [0], [1], [0, 0, 1, 1], [], []>} : vector<8x128xbf16>, vector<128x128xbf16>, vector<8x128xf32> -> vector<8x128xf32>
    %c0_9 = arith.constant 0 : index
    %c0_10 = arith.constant 0 : index
    %11 = vector.load %arg5[%c0_9, %c0_10] : memref<1x128xf32, #tpu.memory_space<vmem>>, vector<1x128xf32>
    %12 = vector.broadcast %11 : vector<1x128xf32> to vector<8x128xf32>
    %13 = arith.addf %10, %12 : vector<8x128xf32>
    %cst_11 = arith.constant 0.000000e+00 : f32
    %14 = vector.broadcast %cst_11 : f32 to vector<8x128xf32>
    %15 = arith.maximumf %13, %14 : vector<8x128xf32>
    %16 = arith.truncf %15 : vector<8x128xf32> to vector<8x128xbf16>
    %c0_12 = arith.constant 0 : index
    %c0_13 = arith.constant 0 : index
    %17 = vector.load %arg6[%c0_12, %c0_13] : memref<128x128xbf16, #tpu.memory_space<vmem>>, vector<128x128xbf16>
    %cst_14 = arith.constant dense<0.000000e+00> : vector<8x128xf32>
    %18 = tpu.matmul %16, %17, %cst_14 {dimension_numbers = #tpu.dot_dimension_numbers<[1], [0], [0], [1], [0, 0, 1, 1], [], []>} : vector<8x128xbf16>, vector<128x128xbf16>, vector<8x128xf32> -> vector<8x128xf32>
    %c0_15 = arith.constant 0 : index
    %c0_16 = arith.constant 0 : index
    %19 = vector.load %arg7[%c0_15, %c0_16] : memref<1x128xf32, #tpu.memory_space<vmem>>, vector<1x128xf32>
    %20 = vector.broadcast %19 : vector<1x128xf32> to vector<8x128xf32>
    %21 = arith.addf %18, %20 : vector<8x128xf32>
    %cst_17 = arith.constant dense<0xFF800000> : vector<8xf32>
    %22 = vector.multi_reduction <maximumf>, %21, %cst_17 [1] : vector<8x128xf32> to vector<8xf32>
    %23 = vector.shape_cast %22 : vector<8xf32> to vector<8x1xf32>
    %24 = vector.broadcast %23 : vector<8x1xf32> to vector<8x128xf32>
    %25 = arith.subf %21, %24 : vector<8x128xf32>
    %26 = math.exp %25 : vector<8x128xf32>
    %cst_18 = arith.constant dense<0.000000e+00> : vector<8xf32>
    %27 = vector.multi_reduction <add>, %26, %cst_18 [1] : vector<8x128xf32> to vector<8xf32>
    %28 = vector.shape_cast %27 : vector<8xf32> to vector<8x1xf32>
    %29 = tpu.reciprocal %28 {approx = true} : vector<8x1xf32> -> vector<8x1xf32>
    %30 = arith.mulf %28, %29 : vector<8x1xf32>
    %cst_19 = arith.constant 2.000000e+00 : f32
    %31 = vector.broadcast %cst_19 : f32 to vector<8x1xf32>
    %32 = arith.subf %31, %30 : vector<8x1xf32>
    %33 = arith.mulf %29, %32 : vector<8x1xf32>
    %34 = vector.broadcast %33 : vector<8x1xf32> to vector<8x128xf32>
    %35 = arith.mulf %26, %34 : vector<8x128xf32>
    %c0_20 = arith.constant 0 : index
    %c0_21 = arith.constant 0 : index
    %36 = vector.load %arg8[%c0_20, %c0_21] : memref<8x128xf32, #tpu.memory_space<vmem>>, vector<8x128xf32>
    tpu.vector_store %arg8[%c0_20, %c0_21], %35 {strides = array<i32>} : memref<8x128xf32, #tpu.memory_space<vmem>>, vector<8x128xf32>,
    return
  }
  func.func @transform_0(%arg0: i32) -> (i32, i32) {
    %c0_i32 = arith.constant 0 : i32
    %c0_i32_0 = arith.constant 0 : i32
    return %arg0, %c0_i32 : i32, i32
  }
  func.func @transform_1(%arg0: i32) -> (i32, i32) {
    %c0_i32 = arith.constant 0 : i32
    %c0_i32_0 = arith.constant 0 : i32
    %c0_i32_1 = arith.constant 0 : i32
    return %c0_i32, %c0_i32_0 : i32, i32
  }
  func.func @transform_2(%arg0: i32) -> (i32, i32) {
    %c0_i32 = arith.constant 0 : i32
    %c0_i32_0 = arith.constant 0 : i32
    %c0_i32_1 = arith.constant 0 : i32
    return %c0_i32, %c0_i32_0 : i32, i32
  }
  func.func @transform_3(%arg0: i32) -> (i32, i32) {
    %c0_i32 = arith.constant 0 : i32
    %c0_i32_0 = arith.constant 0 : i32
    %c0_i32_1 = arith.constant 0 : i32
    return %c0_i32, %c0_i32_0 : i32, i32
  }
  func.func @transform_4(%arg0: i32) -> (i32, i32) {
    %c0_i32 = arith.constant 0 : i32
    %c0_i32_0 = arith.constant 0 : i32
    %c0_i32_1 = arith.constant 0 : i32
    return %c0_i32, %c0_i32_0 : i32, i32
  }
  func.func @transform_5(%arg0: i32) -> (i32, i32) {
    %c0_i32 = arith.constant 0 : i32
    %c0_i32_0 = arith.constant 0 : i32
    %c0_i32_1 = arith.constant 0 : i32
    return %c0_i32, %c0_i32_0 : i32, i32
  }
  func.func @transform_6(%arg0: i32) -> (i32, i32) {
    %c0_i32 = arith.constant 0 : i32
    %c0_i32_0 = arith.constant 0 : i32
    %c0_i32_1 = arith.constant 0 : i32
    return %c0_i32, %c0_i32_0 : i32, i32
  }
  func.func @transform_7(%arg0: i32) -> (i32, i32) {
    %c0_i32 = arith.constant 0 : i32
    %c0_i32_0 = arith.constant 0 : i32
    return %arg0, %c0_i32 : i32, i32
  }
}

</mosaic_0001>

<bundles_post_ra>
// kernel: composer_nn_forward.1
= control target key start
LH: loop header
LB: loop body
LE: loop exit
PB: predicated region body
PF: predicated region fallthrough
CT: control target
= control target key end

     0   :  { %v489_v1 = vmov 0.0   ;;  %vm490_vm0 = vmmov 0   ;;  %vm52_vm1 = vcmask 261120   ;;  %s634_s0 = inlined_call_operand.vmem [shape: bf16[8,32], index: 0, kind: input, shape index: {}]   ;;  %s635_s1 = inlined_call_operand.vmem [shape: bf16[32,128], index: 1, kind: input, shape index: {}]   ;;  %s636_s2 = inlined_call_operand.vmem [shape: f32[1,128], index: 2, kind: input, shape index: {}]   ;;  %s637_s3 = inlined_call_operand.vmem [shape: bf16[128,128], index: 3, kind: input, shape index: {}]   ;;  %s638_s4 = inlined_call_operand.vmem [shape: f32[1,128], index: 4, kind: input, shape index: {}]   ;;  %s639_s5 = inlined_call_operand.vmem [shape: bf16[128,128], index: 5, kind: input, shape index: {}]   ;;  %s640_s6 = inlined_call_operand.vmem [shape: f32[1,128], index: 6, kind: input, shape index: {}]   ;;  %s641_s7 = inlined_call_operand.hbm [shape: f32[8,128], index: 7, kind: output, shape index: {}]  }
   0x1   :  { %v443_v0 = vld [vmem:[%s635_s1] sm:$0xff]   ;;  %392 = vmatprep.subr.bf16.mxu0 %v489_v1  ;;  %400 = vmatprep.subr.bf16.mxu1 %v489_v1  ;;  %v444_v2 = vld [vmem:[%s635_s1 + $0x8] sm:$0xff]   ;;  %v447_v6 = vld [vmem:[%s637_s3 + $0x10] sm:$0xff]  }
   0x2   :  { %393 = vmatpush3.bf16.msra.mxu0 %v443_v0  ;;  %396 = vmatprep.mubr.msk.bf16.mxu0 %vm490_vm0, %v489_v1  ;;  %v445_v3 = vld [vmem:[%s637_s3] sm:$0xff]   ;;  %v446_v4 = vld [vmem:[%s637_s3 + $0x8] sm:$0xff]   ;;  %v448_v7 = vld [vmem:[%s637_s3 + $0x18] sm:$0xff]  }
   0x3   :  { %394 = vmatprep.subr.bf16.mxu0 %v489_v1  ;;  %416 = vmatprep.mubr.msk.bf16.mxu1 %vm490_vm0, %v489_v1  ;;  %v28_v5 = vld [vmem:[%s634_s0] sm:$0xf] }
   0x4   :  { %401 = vmatpush3.bf16.msra.mxu1 %v445_v3 }
   0x5   :  { %402 = vmatprep.subr.bf16.mxu1 %v489_v1 }
   0x6   :  { %395 = vmatpush3.bf16.msra.mxu0 %v444_v2 }
   0x7   :  { %420 = vmatprep.subr.bf16.mxu0 %v489_v1 }
   0x8   :  { %403 = vmatpush3.bf16.msra.mxu1 %v446_v4 }
   0x9   :  { %397 = vmatmul.mubr.msk.bf16.vlgmr.msra.gmra.mrb[0].mxu0 %vm52_vm1, %v28_v5  ;;  %404 = vmatprep.subr.bf16.mxu1 %v489_v1 }
   0xa   :  { %436 = vmatprep.mubr.msk.bf16.mxu0 %vm490_vm0, %v489_v1 }
   0xc   :  { %405 = vmatpush3.bf16.msra.mxu1 %v447_v6 }
   0xd   :  { %406 = vmatprep.subr.bf16.mxu1 %v489_v1 }
   0xe   :  { %12 = vsyncpa [#allocation3], 0  ;;  %v449_v8 = vld [vmem:[%s637_s3 + $0x20] sm:$0xff]   ;;  %v450_v9 = vld [vmem:[%s637_s3 + $0x28] sm:$0xff]  }
   0xf   :  { %v451_v10 = vld [vmem:[%s637_s3 + $0x30] sm:$0xff]   ;;  %v452_v11 = vld [vmem:[%s637_s3 + $0x38] sm:$0xff]   ;;  %v453_v12 = vld [vmem:[%s639_s5] sm:$0xff]  }
  0x10   :  { %407 = vmatpush3.bf16.msra.mxu1 %v448_v7  ;;  %421 = vmatpush3.bf16.msra.mxu0 %v453_v12  ;;  %v454_v13 = vld [vmem:[%s639_s5 + $0x8] sm:$0xff]   ;;  %v455_v14 = vld [vmem:[%s639_s5 + $0x10] sm:$0xff]   ;;  %v456_v15 = vld [vmem:[%s639_s5 + $0x18] sm:$0xff]  }
  0x11   :  { %408 = vmatprep.subr.bf16.mxu1 %v489_v1  ;;  %422 = vmatprep.subr.bf16.mxu0 %v489_v1  ;;  %v457_v16 = vld [vmem:[%s639_s5 + $0x20] sm:$0xff]   ;;  %v458_v17 = vld [vmem:[%s639_s5 + $0x28] sm:$0xff]   ;;  %v459_v26 = vld [vmem:[%s639_s5 + $0x30] sm:$0xff]  }
  0x12   :  { %v349_v18 = vld [vmem:[%s636_s2] ss:$0 sm:$0xff]  ;;  %v460_v27 = vld [vmem:[%s639_s5 + $0x38] sm:$0xff]  }
  0x13   :  { %v353_v28 = vld [vmem:[%s638_s4] ss:$0 sm:$0xff]  ;;  %s491_s4 = smov [#allocation2]  }
  0x14   :  { %409 = vmatpush3.bf16.msra.mxu1 %v449_v8  ;;  %423 = vmatpush3.bf16.msra.mxu0 %v454_v13  ;;  %v362_v36 = vld [vmem:[%s640_s6] ss:$0 sm:$0xff]  ;;  %s341_s5 = sshll.u32 %s491_s4, 4  ;;  %s342_s5 = int_to_ptr.vmem [resolvable:$true] %s341_s5 }
  0x15   :  { %410 = vmatprep.subr.bf16.mxu1 %v489_v1  ;;  %424 = vmatprep.subr.bf16.mxu0 %v489_v1  ;;  %s465_s6 = scalar_lea.vmem %s342_s5, 128  ;;  %p470_p1 = scmp.lt.s32.totalorder %s342_s5, %s342_s5 }
  0x16   :  { %p466_p0 = scmp.ne.s32.totalorder %s342_s5, %s465_s6  ;;  %p471_p2 = scmp.lt.s32.totalorder %s465_s6, %s465_s6 }
  0x18   :  { %411 = vmatpush3.bf16.msra.mxu1 %v450_v9  ;;  %425 = vmatpush3.bf16.msra.mxu0 %v455_v14  ;;  %p472_p3 = por %p471_p2, %p470_p1 }
  0x19   :  { %412 = vmatprep.subr.bf16.mxu1 %v489_v1  ;;  %426 = vmatprep.subr.bf16.mxu0 %v489_v1 }
  0x1a   :  { %p473_p4 = pnand %p472_p3, %p466_p0 }
  0x1c   :  { %413 = vmatpush3.bf16.msra.mxu1 %v451_v10  ;;  %427 = vmatpush3.bf16.msra.mxu0 %v456_v15 }
  0x1d   :  { %414 = vmatprep.subr.bf16.mxu1 %v489_v1  ;;  %428 = vmatprep.subr.bf16.mxu0 %v489_v1 }
  0x20   :  { %415 = vmatpush3.bf16.msra.mxu1 %v452_v11  ;;  %429 = vmatpush3.bf16.msra.mxu0 %v457_v16 }
  0x21   :  { %430 = vmatprep.subr.bf16.mxu0 %v489_v1 }
  0x24   :  { %431 = vmatpush3.bf16.msra.mxu0 %v458_v17 }
  0x25   :  { %432 = vmatprep.subr.bf16.mxu0 %v489_v1 }
  0x28   :  { %433 = vmatpush3.bf16.msra.mxu0 %v459_v26 }
  0x29   :  { %434 = vmatprep.subr.bf16.mxu0 %v489_v1 }
  0x2c   :  { %435 = vmatpush3.bf16.msra.mxu0 %v460_v27 }
  0xdc   :  { %v90_v19 = vpop.f32.mrb[0].mxu0 }
  0xdd   :  { %v91_v20 = vadd.f32 %v349_v18, %v90_v19  ;;  %v398_v21 = vpop.f32.mrb[1].mxu0 }
  0xde   :  { %v93_v22 = vpop.f32.mrb[2].mxu0 }
  0xdf   :  { %v96_v23 = vmax.f32 %v91_v20, 0.0  ;;  %v399_v24 = vpop.f32.mrb[3].mxu0 }
  0xe1   :  { %v97_v25 = vpack.c.bf16 %v96_v23, %v96_v23 }
  0xe3   :  { %417 = vmatmul.mubr.bf16.vlgmr.msra.gmra.mrb[0].mxu1 %v97_v25 }
 0x1b6   :  { %v203_v29 = vpop.f32.mrb[0].mxu1 }
 0x1b7   :  { %v204_v30 = vadd.f32 %v353_v28, %v203_v29  ;;  %v418_v31 = vpop.f32.mrb[1].mxu1 }
 0x1b8   :  { %v206_v32 = vpop.f32.mrb[2].mxu1 }
 0x1b9   :  { %v209_v33 = vmax.f32 %v204_v30, 0.0  ;;  %v419_v34 = vpop.f32.mrb[3].mxu1 }
 0x1bb   :  { %v210_v35 = vpack.c.bf16 %v209_v33, %v209_v33 }
 0x1bd   :  { %437 = vmatmul.mubr.bf16.vlgmr.msra.gmra.mrb[4].mxu0 %v210_v35 }
 0x290   :  { %v316_v37 = vpop.f32.mrb[4].mxu0 }
 0x291   :  { %v317_v38 = vadd.f32 %v362_v36, %v316_v37  ;;  %v438_v39 = vpop.f32.mrb[5].mxu0 }
 0x292   :  { %v319_v40 = vpop.f32.mrb[6].mxu0 }
 0x293   :  { %322 = vmax.xlane.f32.xlu0 %v317_v38  ;;  %v439_v41 = vpop.f32.mrb[7].mxu0 }
 0x320   :  { %v323_v42 = vpop.xlane.xlu0 %322 }
 0x321   :  { %v324_v43 = vsub.f32 %v317_v38, %v323_v42 }
 0x323   :  { %v325_v44 = vmul.f32 1.442695, %v324_v43 }
 0x325   :  { %461 = vpow2.f32 %v325_v44 }
 0x32f   :  { %v462_v45 = vpop.eup %461 }
 0x330   :  { %327 = vadd.xlane.f32.xlu0 %v462_v45 }
 0x3bd   :  { %v328_v46 = vpop.xlane.xlu0 %327 }
 0x3be   :  { %463 = vrcp.f32 %v328_v46 }
 0x3c8   :  { %v464_v47 = vpop.eup %463 }
 0x3c9   :  { %v330_v48 = vmul.f32 %v464_v47, %v328_v46 }
 0x3cb   :  { %v331_v49 = vsub.f32 2.0, %v330_v48 }
 0x3cd   :  { %v332_v50 = vmul.f32 %v464_v47, %v331_v49 }
 0x3cf   :  { %v333_v51 = vmul.f32 %v462_v45, %v332_v50 }
 0x3d1   :  { %334 = vst [vmem:[#allocation2] sm:$0xff] %v333_v51 }
 0x3d2   :  { %476 = shalt.err (!%p473_p4)
}
 0x3d3   :  { %s477_s18 = scalar_lea.hbm %s641_s7, 128 }
 0x3d4   :  { %p478_p5 = scmp.ne.s32.totalorder %s641_s7, %s477_s18  ;;  %p481_p6 = scmp.lt.u32.totalorder %s477_s18, %s641_s7 }
 0x3d6   :  { %p483_p7 = pnand %p481_p6, %p478_p5 }
 0x3d8   :  { %486 = shalt.err (!%p483_p7)
}
 0x3d9   :  { %344 = dma.vmem_to_hbm [thread:$0]  %s342_s5, 128, %s641_s7, [#allocation3]  }
 0x3da   :  { %487 = dma.done.wait [#allocation3], 128  }
 0x3db   :  { %488 = vsyncadd [#allocation3], 4294967168 }
 0x3dc   :  { %348 = vsyncpa [#allocation3], 1 }

</bundles_post_ra>
